<compile_context>
chip_gen: v7x
topology: tpu7x:2x2x1
jax: 0.10.0
libtpu: 0.0.40
codegen_flags: <defaults>
</compile_context>

<pallas_src>
import warnings

import jax
import jax.numpy as jnp
from jax.experimental import pallas as pl
from jax.experimental.pallas import tpu as pltpu

warnings.filterwarnings("ignore", message=".*donated buffer.*")


def _round_up(v, m):
    return -(-v // m) * m


def _vmem_budget_bytes():
    """Per-generation VMEM budget for this kernel's buffering (conservative)."""
    try:
        cap = int(pltpu.get_tpu_info().vmem_capacity_bytes)
        return max(16 << 20, min(cap // 2, 48 << 20))
    except Exception:
        pass
    try:
        kind = jax.devices()[0].device_kind.lower()
    except Exception:
        kind = ""
    if "v7" in kind:
        return 24 << 20          # 64 MiB physical per TC on v7x -> stay well under
    if "v5" in kind or "v6" in kind:
        return 48 << 20          # 128 MiB physical on v5e / v6e
    return 32 << 20


def _select_tiles(B, C, n_new, itemsize, target_block_bytes, vmem_budget):
    """Lane-dense, byte-targeted tiles; never falls back to odd full-dim blocks."""
    # Column tile: multiple of 128, just wide enough to cover the new-class slab
    # in few tiles without dragging in too many untouched old-class columns.
    TC = min(_round_up(max(n_new, 1), 128), _round_up(C, 128), 2048)
    # Row tile: quantized to the packed sublane count for the dtype
    # (8 f32 / 16 bf16 / 32 int8-fp8); sized so one block ~ target_block_bytes.
    row_q = max(8, 32 // max(itemsize, 1))
    TB = max(row_q, (target_block_bytes // (TC * itemsize)) // row_q * row_q)
    TB = min(TB, _round_up(B, row_q))
    # Clamp so in+out double-buffered blocks stay inside the VMEM budget.
    max_tb = (vmem_budget - (2 << 20)) // (4 * TC * itemsize)
    max_tb = max(row_q, (max_tb // row_q) * row_q)
    TB = min(TB, max_tb)
    return TB, TC


def _make_kernel(split_in_tile):
    """split_in_tile: static column offset of the first 'new' class inside the
    first *visited* column tile. 0 => every visited tile is fully new-class."""

    def kernel(alpha_ref, beta_ref, x_ref, o_ref):
        alpha = alpha_ref[0]
        beta = beta_ref[0]
        x = x_ref[...]
        # TODO(synk): on v6e/v7x a bf16-native affine (skip the f32 round-trip)
        # would shave a few VPU casts; kept f32 since the kernel is HBM-bound
        # and f32 compute is required on v5e anyway.
        corrected = (alpha * x.astype(jnp.float32) + beta).astype(o_ref.dtype)

        if split_in_tile == 0:
            # All visited tiles lie entirely inside the new-class slab.
            o_ref[...] = corrected
        else:
            j = pl.program_id(1)

            @pl.when(j == 0)   # boundary tile: mask old vs new columns
            def _():
                col = jax.lax.broadcasted_iota(jnp.int32, (1, x.shape[1]), 1)
                o_ref[...] = jnp.where(col >= split_in_tile, corrected, x)

            @pl.when(j > 0)    # tiles fully inside the new-class slab
            def _():
                o_ref[...] = corrected

    return kernel


def _bias_corrector_impl(x, alpha, beta, *, n_new_class, target_block_bytes=2 << 20):
    B, C = x.shape
    n_new = int(n_new_class)
    if n_new <= 0:
        return x
    n_new = min(n_new, C)
    split = C - n_new                         # first corrected column (static)
    itemsize = jnp.dtype(x.dtype).itemsize

    vmem_budget = _vmem_budget_bytes()
    TB, TC = _select_tiles(B, C, n_new, itemsize, int(target_block_bytes), vmem_budget)

    first_new_block = split // TC             # first column tile that is touched
    n_col_tiles = pl.cdiv(C, TC) - first_new_block   # >= 1
    split_in_tile = split - first_new_block * TC

    grid = (pl.cdiv(B, TB), n_col_tiles)
    spec = pl.BlockSpec((TB, TC), lambda i, j: (i, j + first_new_block))

    alpha_a = jnp.asarray(alpha, jnp.float32).reshape(1)
    beta_a = jnp.asarray(beta, jnp.float32).reshape(1)

    visited_cols = C - first_new_block * TC
    cost = pl.CostEstimate(
        flops=int(2 * B * visited_cols),
        transcendentals=0,
        bytes_accessed=int(2 * B * visited_cols * itemsize))

    block_bytes = TB * TC * itemsize
    vmem_limit = int(min(vmem_budget, max(4 * block_bytes + (2 << 20), 16 << 20)))

    # TODO(synk): on v7x, if xprof shows single-core execution, switch the row
    # axis to pltpu.CORE_PARALLEL so both TensorCores issue DMAs.
    return pl.pallas_call(
        _make_kernel(split_in_tile),
        out_shape=jax.ShapeDtypeStruct((B, C), x.dtype),
        grid=grid,
        in_specs=[
            pl.BlockSpec(memory_space=pltpu.SMEM),   # alpha (scalar)
            pl.BlockSpec(memory_space=pltpu.SMEM),   # beta  (scalar)
            spec,                                    # x: only new-class column tiles
        ],
        out_specs=spec,
        input_output_aliases={2: 0},                 # untouched columns = x (aliased)
        compiler_params=pltpu.CompilerParams(
            dimension_semantics=("parallel", "parallel"),
            vmem_limit_bytes=vmem_limit,
        ),
        cost_estimate=cost,
    )(alpha_a, beta_a, x)


_bias_corrector_donating = jax.jit(
    _bias_corrector_impl,
    static_argnames=("n_new_class", "target_block_bytes"),
    donate_argnums=(0,))

_bias_corrector_copying = jax.jit(
    _bias_corrector_impl,
    static_argnames=("n_new_class", "target_block_bytes"))


def bias_corrector(x, alpha, beta, n_new_class, *,
                   target_block_bytes=2 << 20, donate=True):
    """out[:, :C-n_new] = x[:, :C-n_new]; out[:, C-n_new:] = alpha*x[...] + beta.

    With donate=True (default) x is donated, so the aliased output reuses its
    buffer and only the new-class columns generate HBM traffic. Do NOT reuse x
    after a donating call. Use donate=False if the caller still needs x.
    """
    fn = _bias_corrector_donating if donate else _bias_corrector_copying
    return fn(x, alpha, beta, n_new_class=n_new_class,
              target_block_bytes=target_block_bytes)


def _reference(x, alpha, beta, n_new):
    split = max(0, x.shape[1] - n_new)
    x_n = (alpha * x[:, split:].astype(jnp.float32) + beta).astype(x.dtype)
    return jnp.concatenate([x[:, :split], x_n], axis=-1)


if __name__ == "__main__":
    key = jax.random.PRNGKey(0)
    k1, k2 = jax.random.split(key)
    alpha, beta = 1.5, -0.25

    # --- Test 1: f32. C=384, n_new=160 -> TC=256; split=224 lands mid-tile
    # (boundary mask) and the second column tile is ragged (cdiv grid, padded
    # reads / clipped writes). Old columns 0..127-equivalent are handled by the
    # boundary mask + aliasing.
    B1, C1, n1 = 16, 384, 160
    x1 = jax.random.normal(k1, (B1, C1), dtype=jnp.float32)
    ref1 = _reference(x1, alpha, beta, n1)                 # compute ref before donation
    out1 = jax.block_until_ready(bias_corrector(x1, alpha, beta, n1))
    assert out1.shape == (B1, C1) and out1.dtype == jnp.float32
    assert jnp.allclose(out1, ref1, atol=1e-6), "mismatch vs reference (test 1)"
    del x1  # donated -- must not be reused

    # --- Test 2: bf16, tiny non-128-divisible C -> single padded (16,128)
    # block with the old/new boundary masked inside it; f32 compute, cast at
    # the store.
    B2, C2, n2 = 8, 20, 5
    x2 = jax.random.normal(k2, (B2, C2), dtype=jnp.float32).astype(jnp.bfloat16)
    ref2 = _reference(x2, alpha, beta, n2)
    out2 = jax.block_until_ready(bias_corrector(x2, alpha, beta, n2))
    assert out2.shape == (B2, C2) and out2.dtype == jnp.bfloat16
    assert jnp.allclose(out2.astype(jnp.float32), ref2.astype(jnp.float32),
                        atol=1e-2), "mismatch vs reference (test 2)"
    del x2

    print("KERNEL_OK")
</pallas_src>

<mosaic_0001>
module attributes {stable_mosaic.version = 11 : i64} {
  func.func @kernel(%arg0: i32, %arg1: i32, %arg2: memref<1xf32, #tpu.memory_space<smem>>, %arg3: memref<1xf32, #tpu.memory_space<smem>>, %arg4: memref<16x256xf32, #tpu.memory_space<vmem>>, %arg5: memref<16x256xf32, #tpu.memory_space<vmem>>) attributes {dimension_semantics = [#tpu.dimension_semantics<parallel>, #tpu.dimension_semantics<parallel>], iteration_bounds = array<i64: 1, 2>, scalar_prefetch = 0 : i64, scratch_operands = 0 : i64, tpu.core_type = #tpu.core_type<tc>, window_params = [{transform_indices = @transform_0, window_bounds = array<i64: 1>}, {transform_indices = @transform_1, window_bounds = array<i64: 1>}, {transform_indices = @transform_2, window_bounds = array<i64: 16, 256>}, {transform_indices = @transform_3, window_bounds = array<i64: 16, 256>}]} {
    %c0 = arith.constant 0 : index
    %0 = memref.load %arg2[%c0] : memref<1xf32, #tpu.memory_space<smem>>
    %c0_0 = arith.constant 0 : index
    %1 = memref.load %arg3[%c0_0] : memref<1xf32, #tpu.memory_space<smem>>
    %c0_1 = arith.constant 0 : index
    %c0_2 = arith.constant 0 : index
    %2 = vector.load %arg4[%c0_1, %c0_2] : memref<16x256xf32, #tpu.memory_space<vmem>>, vector<16x256xf32>
    %3 = vector.broadcast %0 : f32 to vector<16x256xf32>
    %4 = arith.mulf %3, %2 : vector<16x256xf32>
    %5 = vector.broadcast %1 : f32 to vector<16x256xf32>
    %6 = arith.addf %4, %5 : vector<16x256xf32>
    %c0_i32 = arith.constant 0 : i32
    %7 = arith.cmpi eq, %arg1, %c0_i32 : i32
    %8 = arith.extui %7 : i1 to i32
    %c0_i32_3 = arith.constant 0 : i32
    %9 = arith.cmpi ne, %8, %c0_i32_3 : i32
    scf.if %9 {
      %13 = tpu.iota {dimensions = array<i32: 1>} : vector<1x256xi32>
      %c224_i32 = arith.constant 224 : i32
      %14 = vector.broadcast %c224_i32 : i32 to vector<1x256xi32>
      %15 = arith.cmpi sge, %13, %14 : vector<1x256xi32>
      %16 = vector.shape_cast %15 : vector<1x256xi1> to vector<1x256xi1>
      %17 = vector.broadcast %16 : vector<1x256xi1> to vector<16x256xi1>
      %18 = arith.select %17, %6, %2 : vector<16x256xi1>, vector<16x256xf32>
      %c0_6 = arith.constant 0 : index
      %c0_7 = arith.constant 0 : index
      %19 = vector.load %arg5[%c0_6, %c0_7] : memref<16x256xf32, #tpu.memory_space<vmem>>, vector<16x256xf32>
      tpu.vector_store %arg5[%c0_6, %c0_7], %18 {strides = array<i32>} : memref<16x256xf32, #tpu.memory_space<vmem>>, vector<16x256xf32>,
    } else {
    }
    %c0_i32_4 = arith.constant 0 : i32
    %10 = arith.cmpi sgt, %arg1, %c0_i32_4 : i32
    %11 = arith.extui %10 : i1 to i32
    %c0_i32_5 = arith.constant 0 : i32
    %12 = arith.cmpi ne, %11, %c0_i32_5 : i32
    scf.if %12 {
      %c0_6 = arith.constant 0 : index
      %c0_7 = arith.constant 0 : index
      %13 = vector.load %arg5[%c0_6, %c0_7] : memref<16x256xf32, #tpu.memory_space<vmem>>, vector<16x256xf32>
      tpu.vector_store %arg5[%c0_6, %c0_7], %6 {strides = array<i32>} : memref<16x256xf32, #tpu.memory_space<vmem>>, vector<16x256xf32>,
    } else {
    }
    return
  }
  func.func @transform_0(%arg0: i32, %arg1: i32) -> i32 {
    %c0_i32 = arith.constant 0 : i32
    %c0_i32_0 = arith.constant 0 : i32
    return %c0_i32 : i32
  }
  func.func @transform_1(%arg0: i32, %arg1: i32) -> i32 {
    %c0_i32 = arith.constant 0 : i32
    %c0_i32_0 = arith.constant 0 : i32
    return %c0_i32 : i32
  }
  func.func @transform_2(%arg0: i32, %arg1: i32) -> (i32, i32) {
    %c0_i32 = arith.constant 0 : i32
    %0 = arith.addi %arg1, %c0_i32 : i32
    %c0_i32_0 = arith.constant 0 : i32
    return %arg0, %0 : i32, i32
  }
  func.func @transform_3(%arg0: i32, %arg1: i32) -> (i32, i32) {
    %c0_i32 = arith.constant 0 : i32
    %0 = arith.addi %arg1, %c0_i32 : i32
    %c0_i32_0 = arith.constant 0 : i32
    return %arg0, %0 : i32, i32
  }
}

</mosaic_0001>

<bundles_post_ra>
// kernel: _bias_corrector_impl.1
= control target key start
LH: loop header
LB: loop body
LE: loop exit
PB: predicated region body
PF: predicated region fallthrough
CT: control target
= control target key end

     0   :  { %s827_s0 = inlined_call_operand.<no memory space> [shape: f32[1], index: 0, kind: input, shape index: {}]   ;;  %s828_s1 = inlined_call_operand.<no memory space> [shape: f32[1], index: 1, kind: input, shape index: {}]   ;;  %s829_s2 = inlined_call_operand.hbm [shape: f32[16,384], index: 2, kind: input, shape index: {}, may-alias: {2,3}]   ;;  %s830_s3 = inlined_call_operand.hbm [shape: f32[16,384], index: 3, kind: output, shape index: {}, may-alias: {2,3}]  }
   0x1   :  { %8 = sst [smem:[#allocation2]] %s827_s0 }
   0x2   :  { %9 = sst [smem:[#allocation3]] %s828_s1 }
   0x3   :  { %10 = vsyncpa [#allocation5], 0 }
   0x4   :  { %12 = vsyncpa [#allocation5 + $0x1], 0 }
   0x5   :  { %13 = vsyncpa [#allocation6], 0 }
   0x6   :  { %15 = vsyncpa [#allocation6 + $0x1], 0  ;;  %s621_s16 = smov 0   ;;  %s623_s17 = smov 0  }
   0x7   :  { %s625_s18 = smov 0   ;;  %s627_s19 = smov 0  }
   0x8   :  { %s629_s20 = smov 0   ;;  %s631_s21 = smov 0  }
   0x9 LB: > { %s385_s0 = sadd.s32 4294967295, %s587_s21   ;;  %s386_s1 = sadd.s32 4294967294, %s587_s21   ;;  %s587_s21 = sphi %s631_s21, %s21_s21   ;;  %s583_s20 = sphi %s629_s20, %s841_s20   ;;  %s579_s19 = sphi %s627_s19, %s840_s19   ;;  %s575_s18 = sphi %s625_s18, %s839_s18   ;;  %s571_s17 = sphi %s623_s17, %s838_s17   ;;  %s567_s16 = sphi %s621_s16, %s837_s16  }
   0xa   : > { %s30_s22 = sadd.s32 1, %s583_s20  ;;  %s84_s23 = sadd.s32 1, %s575_s18 }
   0xb   : > { %p31_p0 = scmp.ge.s32.totalorder %s30_s22, 2  ;;  %p91_p1 = scmp.ne.s32.totalorder %s575_s18, %s571_s17 }
   0xc   : > { %p92_p2 = scmp.eq.s32.totalorder %s587_s21, 0  ;;  %p97_p3 = scmp.ne.s32.totalorder %s571_s17, %s567_s16 }
   0xd   : > { %s843_s22 = smov (%p31_p0, %s30_s22), 0  ;;  %p98_p5 = scmp.eq.s32.totalorder %s385_s0, 0 }
   0xe   : > { %p93_p4 = por %p92_p2, %p91_p1  ;;  %s80_s24 = ssub.s32 %s583_s20, %s843_s22 }
   0xf   : > { %p123_p6 = scmp.eq.s32.totalorder %s385_s0, 1  ;;  %p82_p7 = scmp.eq.s32.totalorder %s80_s24, 0 }
  0x10   : > { %p664_p8 = por %p98_p5, %p97_p3  ;;  %p129_p10 = scmp.eq.s32.totalorder %s386_s1, 1 }
  0x11   : > { %p668_p9 = por %p123_p6, %p91_p1  ;;  %p831_p12 = scmp.ge.s32.totalorder %s587_s21, 2 }
  0x12   : > { %s673_s27 = scalar_select %p82_p7, %s575_s18, %s84_s23  }
  0x13   : > { %p675_p11 = por %p129_p10, %p97_p3  ;;  %151 = sbr.rel (%p831_p12) target bundleno = 61 (0x3d), region = 24 }
  0x15   : > { %s834_s28 = scalar_select %p675_p11, 1, 0 }
  0x1a   : > { %154 = sbr.rel (!%p93_p4) target bundleno = 61 (0x3d), region = 28  ;;  %s155_s29 = sand.u32 (%p93_p4), 1, %s575_s18  }
  0x1b   : > { %s390_s30 = sshll.u32 (%p93_p4), %s583_s20, 1  ;;  %s389_s4 = sshll.u32 (%p93_p4), %s155_s29, 5 }
  0x1c   : > { %s162_s5 = ssub.s32 (%p93_p4), 3, %s390_s30  ;;  %s690_s8 = scalar_lea.sflag (%p93_p4), [#allocation5], %s155_s29 }
  0x1d   : > { %p163_p13 = scmp.lt.s32.totalorder (%p93_p4), %s162_s5, 2  ;;  %s159_s9 = scalar_lea.vmem (%p93_p4), [#allocation4], %s389_s4 }
  0x21   : > { %s845_s5 = smov (!%p163_p13, %s162_s5), 2 }
  0x22   : > { %s687_s6 = sshll.u32 %s845_s5, 8 }
  0x23   : > { %s167_s7 = ssub.s32 512, %s687_s6 }
  0x24   : > { %168 = vsyncadd %s690_s8, %s167_s7  ;;  %p392_p0 = scmp.ne.s32.totalorder %s687_s6, 0  ;;  %s412_s10 = sshll.u32 %s583_s20, 8 }
  0x25   : > { %s698_s13 = scalar_lea.hbm %s829_s2, %s412_s10  ;;  %s394_s14 = sshll.u32 %s845_s5, 3 }
  0x26   : > { %s176_s15 = sshll.u32 %s159_s9, 4  ;;  %s477_s0 = scalar_lea.hbm %s698_s13, %s687_s6  ;;  %s701_s15 = int_to_ptr.vmem [resolvable:$true] %s176_s15 }
  0x27   : > { %p478_p1 = scmp.ne.s32.totalorder %s698_s13, %s477_s0  ;;  %s481_s24 = scalar_lea.hbm %s829_s2, 768 }
  0x28   : > { %p482_p4 = scmp.lt.u32.totalorder %s698_s13, %s829_s2  ;;  %p483_p5 = scmp.lt.u32.totalorder %s481_s24, %s477_s0 }
  0x29   : > { %p479_p2 = pnand %p478_p1, %p392_p0  ;;  %p485_p7 = scmp.lt.u32.totalorder %s477_s0, %s698_s13 }
  0x2a   : > { %p484_p6 = por %p483_p5, %p482_p4 }
  0x2b   : > { %p480_p3 = pneg %p479_p2 }
  0x2c   : > { %p486_p10 = por %p485_p7, %p484_p6 }
  0x2e   : > { %p487_p13 = pnand %p486_p10, %p480_p3 }
  0x30   : > { %490 = shalt.err (!%p487_p13)
}
  0x31   : > { %s491_s4 = scalar_lea.vmem %s701_s15, %s687_s6  ;;  %s589_s7 = smov [#allocation4]  }
  0x32   : > { %p492_p1 = scmp.ne.s32.totalorder %s701_s15, %s491_s4  ;;  %s495_s9 = sshll.u32 %s589_s7, 4  ;;  %s496_s9 = int_to_ptr.vmem [resolvable:$false] %s495_s9 }
  0x33   : > { %s497_s10 = scalar_lea.vmem %s496_s9, 1024  ;;  %p498_p11 = scmp.lt.s32.totalorder %s701_s15, %s496_s9 }
  0x34   : > { %p493_p2 = pnand %p492_p1, %p392_p0  ;;  %p499_p4 = scmp.lt.s32.totalorder %s497_s10, %s491_s4 }
  0x36   : > { %p494_p12 = pneg %p493_p2  ;;  %p500_p5 = por %p499_p4, %p498_p11 }
  0x38   : > { %p501_p6 = pnand %p500_p5, %p494_p12 }
  0x3a   : > { %504 = shalt.err (!%p501_p6)
}
  0x3b   : > { %s590_s11 = smov 384   ;;  %s591_s12 = smov 256  }
  0x3c   : > { %182 = dma.hbm_to_vmem [thread:$0]  (%p392_p0), %s698_s13, %s687_s6, %s701_s15, %s690_s8, %s590_s11, %s591_s12, %s394_s14  }
  0x3d PF: > { %p397_p3 = scmp.ge.s32.totalorder %s587_s21, 1  ;;  %p184_p7 = scmp.lt.s32.totalorder %s587_s21, 3 }
  0x3f   : > { %p185_p11 = pnand %p397_p3, %p184_p7 }
  0x40   : > { %s733_s0 = sand.u32 (!%p185_p11), 1, %s571_s17  }
  0x41   : > { %188 = sbr.rel (%p185_p11) target bundleno = 132 (0x84), region = 32  ;;  %s398_s1 = sshll.u32 (!%p185_p11), %s733_s0, 5 }
  0x42   : > { %s191_s23 = scalar_lea.sflag (!%p185_p11), [#allocation5], %s733_s0  ;;  %s194_s24 = scalar_lea.vmem (!%p185_p11), [#allocation4], %s398_s1 }
  0x48   : > { %558 = dma.done.wait (%p664_p8), %s191_s23, 512  }
  0x49   : > { %560 = vsyncadd (%p664_p8), %s191_s23, 4294966784  ;;  %s229_s5 = sld [smem:[#allocation2]]  ;;  %v231_v0 = vld [vmem:[%s194_s24] sm:$0xff]  ;;  %v232_v1 = vld [vmem:[%s194_s24 + $0x8] sm:$0xff]  ;;  %s741_s8 = scalar_lea.vmem [#allocation7], %s398_s1 }
  0x4a   : > { %s230_s6 = sld [smem:[#allocation3]]  ;;  %v233_v2 = vld [vmem:[%s194_s24 + $0x10] sm:$0xff]  ;;  %v234_v4 = vld [vmem:[%s194_s24 + $0x18] sm:$0xff]  ;;  %p400_p8 = scmp.ne.s32.totalorder %s579_s19, 0 }
  0x4b   : > { %262 = vst [vmem:[%s741_s8] sm:$0xff] (!%p400_p8), %v231_v0  ;;  %v249_v14 = vlaneseq (!%p400_p8)  ;;  %264 = vst [vmem:[%s741_s8 + $0x10] sm:$0xff] (!%p400_p8), %v233_v2 }
  0x4d   : > { %248 = sbr.rel (%p400_p8) target bundleno = 87 (0x57), region = 40  ;;  %v250_v15 = vand.u32 (!%p400_p8), 127, %v249_v14 }
  0x4f   : > { %v235_v3 = vstv %s229_s5  ;;  %v251_v16 = vadd.s32 (!%p400_p8), 128, %v250_v15 }
  0x50   : > { %v236_v5 = vmul.f32 %v235_v3, %v231_v0  ;;  %v237_v6 = vmul.f32 %v235_v3, %v232_v1  ;;  %v238_v7 = vmul.f32 %v235_v3, %v233_v2  ;;  %v240_v8 = vstv %s230_s6 }
  0x51   : > { %v239_v9 = vmul.f32 %v235_v3, %v234_v4  ;;  %vm253_vm0 = vcmp.ge.s32.totalorder (!%p400_p8), %v251_v16, 224 }
  0x52   : > { %v241_v10 = vadd.f32 %v240_v8, %v236_v5  ;;  %v242_v11 = vadd.f32 %v240_v8, %v237_v6  ;;  %v243_v12 = vadd.f32 %v240_v8, %v238_v7 }
  0x53   : > { %v244_v13 = vadd.f32 %v240_v8, %v239_v9 }
  0x54   : > { %v259_v17 = vsel %vm253_vm0, %v242_v11, %v232_v1 }
  0x55   : > { %v261_v18 = vsel %vm253_vm0, %v244_v13, %v234_v4  ;;  %263 = vst [vmem:[%s741_s8 + $0x8] sm:$0xff] %v259_v17 }
  0x56   : > { %265 = vst [vmem:[%s741_s8 + $0x18] sm:$0xff] %v261_v18 }
  0x57 PF: > { %p401_p12 = scmp.le.s32.totalorder %s579_s19, 0 }
  0x58   : > { %270 = vst [vmem:[%s741_s8] sm:$0xff] (!%p401_p12), %v241_v10  ;;  %271 = vst [vmem:[%s741_s8 + $0x8] sm:$0xff] (!%p401_p12), %v242_v11 }
  0x59   : > { %269 = sbr.rel (%p401_p12) target bundleno = 96 (0x60), region = 44  ;;  %272 = vst [vmem:[%s741_s8 + $0x10] sm:$0xff] (!%p401_p12), %v243_v12  ;;  %273 = vst [vmem:[%s741_s8 + $0x18] sm:$0xff] (!%p401_p12), %v244_v13 }
  0x60 PF: > { %s275_s25 = scalar_lea.sflag [#allocation6], %s733_s0  ;;  %281 = sbr.rel (!%p668_p9) target bundleno = 132 (0x84), region = 48 }
  0x61   : > { %s403_s13 = sshll.u32 (%p668_p9), %s579_s19, 1 }
  0x62   : > { %s284_s14 = ssub.s32 (%p668_p9), 3, %s403_s13 }
  0x63   : > { %p285_p0 = scmp.lt.s32.totalorder (%p668_p9), %s284_s14, 2 }
  0x67   : > { %s847_s14 = smov (!%p285_p0, %s284_s14), 2 }
  0x68   : > { %s760_s15 = sshll.u32 %s847_s14, 8 }
  0x69   : > { %s289_s29 = ssub.s32 512, %s760_s15 }
  0x6a   : > { %290 = vsyncadd %s275_s25, %s289_s29  ;;  %p405_p9 = scmp.ne.s32.totalorder %s760_s15, 0  ;;  %s415_s26 = sshll.u32 %s579_s19, 8 }
  0x6b   : > { %s770_s7 = scalar_lea.hbm %s830_s3, %s415_s26  ;;  %s407_s9 = sshll.u32 %s847_s14, 3 }
  0x6c   : > { %s298_s10 = sshll.u32 %s741_s8, 4  ;;  %s592_s12 = smov [#allocation7]   ;;  %s774_s10 = int_to_ptr.vmem [resolvable:$true] %s298_s10 }
  0x6d   : > { %s505_s11 = scalar_lea.vmem %s774_s10, %s760_s15  ;;  %s509_s1 = sshll.u32 %s592_s12, 4  ;;  %s510_s1 = int_to_ptr.vmem [resolvable:$false] %s509_s1 }
  0x6e   : > { %p506_p10 = scmp.ne.s32.totalorder %s774_s10, %s505_s11  ;;  %s511_s19 = scalar_lea.vmem %s510_s1, 1024 }
  0x6f   : > { %p512_p2 = scmp.lt.s32.totalorder %s774_s10, %s510_s1  ;;  %p513_p4 = scmp.lt.s32.totalorder %s511_s19, %s505_s11 }
  0x70   : > { %p507_p13 = pnand %p506_p10, %p405_p9 }
  0x71   : > { %p514_p5 = por %p513_p4, %p512_p2 }
  0x72   : > { %p508_p1 = pneg %p507_p13 }
  0x74   : > { %p515_p6 = pnand %p514_p5, %p508_p1 }
  0x76   : > { %518 = shalt.err (!%p515_p6)
}
  0x77   : > { %s519_s23 = scalar_lea.hbm %s770_s7, %s760_s15  ;;  %s523_s6 = scalar_lea.hbm %s830_s3, 768 }
  0x78   : > { %p520_p3 = scmp.ne.s32.totalorder %s770_s7, %s519_s23  ;;  %p524_p8 = scmp.lt.u32.totalorder %s770_s7, %s830_s3 }
  0x79   : > { %p525_p12 = scmp.lt.u32.totalorder %s523_s6, %s519_s23  ;;  %p527_p10 = scmp.lt.u32.totalorder %s519_s23, %s770_s7 }
  0x7a   : > { %p521_p7 = pnand %p520_p3, %p405_p9 }
  0x7b   : > { %p526_p0 = por %p525_p12, %p524_p8 }
  0x7c   : > { %p522_p11 = pneg %p521_p7 }
  0x7d   : > { %p528_p13 = por %p527_p10, %p526_p0 }
  0x7f   : > { %p529_p1 = pnand %p528_p13, %p522_p11 }
  0x81   : > { %532 = shalt.err (!%p529_p1)
}
  0x82   : > { %s593_s29 = smov 256   ;;  %s594_s26 = smov 384  }
  0x83   : > { %304 = dma.vmem_to_hbm [thread:$0]  (%p405_p9), %s774_s10, %s760_s15, %s770_s7, %s275_s25, %s593_s29, %s594_s26, %s407_s9  }
  0x84 PF: > { %s313_s30 = sand.u32 1, %s567_s16   ;;  %p835_p2 = scmp.ne.s32.totalorder %s834_s28, 0 }
  0x85   : > { %p836_p4 = scmp.ge.s32.totalorder %s587_s21, 2  ;;  %s314_s4 = scalar_lea.sflag [#allocation6], %s313_s30 }
  0x87   : > { %p421_p5 = pnand %p836_p4, %p835_p2 }
  0x89   : > { %562 = dma.done.wait (!%p421_p5), %s314_s4, 512  }
  0x8a   : > { %564 = vsyncadd (!%p421_p5), %s314_s4, 4294966784  ;;  %s21_s21 = sadd.s32 1, %s587_s21   ;;  %s837_s16 = smov %s571_s17 }
  0x8b   : > { %p18_p6 = scmp.ge.s32.totalorder %s21_s21, 4   ;;  %s838_s17 = smov %s575_s18 }
  0x8c   : > { %s839_s18 = smov %s673_s27  ;;  %s840_s19 = smov %s583_s20 }
  0x8d   : > { %s841_s20 = smov %s843_s22  ;;  %20 = sbr.rel (!%p18_p6) target bundleno = 9 (0x9), region = 85 }
  0x94   :  { %319 = vsyncpa [#allocation5], 1 }
  0x95   :  { %321 = vsyncpa [#allocation5 + $0x1], 1 }
  0x96   :  { %322 = vsyncpa [#allocation6], 1 }
  0x97   :  { %324 = vsyncpa [#allocation6 + $0x1], 1 }

</bundles_post_ra>
